<compile_context>
chip_gen: v7x
topology: tpu7x:2x2x1
jax: 0.10.0
libtpu: 0.0.40
codegen_flags: <defaults>
</compile_context>

<pallas_src>
import functools

import jax
import jax.numpy as jnp
from jax import lax
from jax.experimental import pallas as pl
from jax.experimental.pallas import tpu as pltpu

# dropout rates used by the original script (d2l defaults)
DROPOUT1 = 0.2
DROPOUT2 = 0.5


def _i32(v):
    """Python int -> equivalent int32 (two's complement) Python int."""
    v &= 0xFFFFFFFF
    return v - 0x100000000 if v >= 0x80000000 else v


_MIX1 = _i32(0x7FEB352D)
_MIX2 = _i32(0x846CA68B)
_GOLDEN = _i32(0x9E3779B9)


def _hash_i32(x):
    """xorshift-multiply hash (murmur-style finalizer) on int32 lanes."""
    x = x ^ lax.shift_right_logical(x, 16)
    x = x * _MIX1
    x = x ^ lax.shift_right_logical(x, 15)
    x = x * _MIX2
    x = x ^ lax.shift_right_logical(x, 16)
    return x


def _dropout(h, p, seed, *, layer, block_rows):
    """Inverted dropout with a stateless per-element hash PRNG.

    Bits are keyed on (global row, column, seed, layer): every batch tile
    draws an independent mask and the result is invariant to the tiling.
    (Not bit-identical to torch.rand — same distribution/semantics.)
    """
    if p >= 1.0:
        return jnp.zeros_like(h)
    rows, cols = h.shape
    row0 = pl.program_id(0) * block_rows
    r = lax.broadcasted_iota(jnp.int32, (rows, cols), 0) + row0
    c = lax.broadcasted_iota(jnp.int32, (rows, cols), 1)
    key = r * cols + c
    key = key ^ (seed * _GOLDEN) ^ _i32(layer * 0x85EBCA6B)
    bits = _hash_i32(key) & 0x7FFFFFFF              # uniform over [0, 2^31)
    thr = min(int(p * float(1 << 31)), (1 << 31) - 1)
    scale = jnp.float32(1.0 / (1.0 - p))
    return jnp.where(bits >= thr, h * scale, jnp.float32(0.0))


def mlp_kernel(seed_ref, x_ref, w1_ref, b1_ref, w2_ref, b2_ref, w3_ref, b3_ref,
               out_ref, *, dropout1, dropout2, training, block_rows):
    seed = seed_ref[0]
    mm_dtype = w1_ref.dtype  # bf16 weights; MXU accumulates in f32

    # ---- lin1 + ReLU (+ dropout) ----
    h1 = jnp.dot(x_ref[...].astype(mm_dtype), w1_ref[...],
                 preferred_element_type=jnp.float32) + b1_ref[...]
    h1 = jnp.maximum(h1, 0.0)
    if training and dropout1 > 0.0:
        h1 = _dropout(h1, dropout1, seed, layer=1, block_rows=block_rows)

    # ---- lin2 + ReLU (+ dropout) ----
    h2 = jnp.dot(h1.astype(mm_dtype), w2_ref[...],
                 preferred_element_type=jnp.float32) + b2_ref[...]
    h2 = jnp.maximum(h2, 0.0)
    if training and dropout2 > 0.0:
        h2 = _dropout(h2, dropout2, seed, layer=2, block_rows=block_rows)

    # ---- lin3 ----
    out = jnp.dot(h2.astype(mm_dtype), w3_ref[...],
                  preferred_element_type=jnp.float32) + b3_ref[...]
    out_ref[...] = out.astype(out_ref.dtype)


def _round_up(n, m):
    return (n + m - 1) // m * m


def net_forward(x, params, seed, *, num_inputs, training=True,
                dropout1=DROPOUT1, dropout2=DROPOUT2, block_rows=256):
    """Forward pass of Net. x is reshaped to (-1, num_inputs) like the PyTorch module."""
    x2d = x.reshape((-1, num_inputs)).astype(jnp.float32)
    batch = x2d.shape[0]
    w1, b1, w2, b2, w3, b3 = params
    num_outputs = w3.shape[1]

    # Pad feature dims to multiples of 128 (lane-dense, full MXU); padding
    # with zeros is semantics-preserving (padded units stay exactly zero).
    K = _round_up(num_inputs, 128)
    H1 = _round_up(w1.shape[1], 128)
    H2 = _round_up(w2.shape[1], 128)
    N = _round_up(num_outputs, 128)

    # Batch tile: multiple of 8 sublanes, padded batch divides evenly.
    tb = min(block_rows, _round_up(batch, 8))
    B = _round_up(batch, tb)

    mm_dtype = jnp.bfloat16
    xp = jnp.pad(x2d, ((0, B - batch), (0, K - num_inputs)))
    w1p = jnp.pad(w1, ((0, K - w1.shape[0]), (0, H1 - w1.shape[1]))).astype(mm_dtype)
    w2p = jnp.pad(w2, ((0, H1 - w2.shape[0]), (0, H2 - w2.shape[1]))).astype(mm_dtype)
    w3p = jnp.pad(w3, ((0, H2 - w3.shape[0]), (0, N - w3.shape[1]))).astype(mm_dtype)
    b1p = jnp.pad(b1, ((0, 0), (0, H1 - b1.shape[1]))).astype(jnp.float32)
    b2p = jnp.pad(b2, ((0, 0), (0, H2 - b2.shape[1]))).astype(jnp.float32)
    b3p = jnp.pad(b3, ((0, 0), (0, N - b3.shape[1]))).astype(jnp.float32)

    grid = (B // tb,)

    kernel = functools.partial(
        mlp_kernel, dropout1=float(dropout1), dropout2=float(dropout2),
        training=bool(training), block_rows=tb)

    flops = int(2 * B * (K * H1 + H1 * H2 + H2 * N))
    bytes_accessed = int(
        xp.size * 4 + B * N * 4
        + (w1p.size + w2p.size + w3p.size) * 2
        + (b1p.size + b2p.size + b3p.size) * 4)

    out_padded = pl.pallas_call(
        kernel,
        out_shape=jax.ShapeDtypeStruct((B, N), jnp.float32),
        grid=grid,
        in_specs=[
            pl.BlockSpec(memory_space=pltpu.MemorySpace.SMEM),   # seed (scalar)
            pl.BlockSpec((tb, K), lambda i: (i, 0)),             # x tile (streamed)
            pl.BlockSpec((K, H1), lambda i: (0, 0)),             # w1 (resident)
            pl.BlockSpec((1, H1), lambda i: (0, 0)),             # b1
            pl.BlockSpec((H1, H2), lambda i: (0, 0)),            # w2
            pl.BlockSpec((1, H2), lambda i: (0, 0)),             # b2
            pl.BlockSpec((H2, N), lambda i: (0, 0)),             # w3
            pl.BlockSpec((1, N), lambda i: (0, 0)),              # b3
        ],
        out_specs=pl.BlockSpec((tb, N), lambda i: (i, 0)),       # lane-dense (N % 128 == 0)
        compiler_params=pltpu.CompilerParams(
            dimension_semantics=("parallel",)),
        cost_estimate=pl.CostEstimate(
            flops=flops, transcendentals=0, bytes_accessed=bytes_accessed),
    )(seed, xp, w1p, b1p, w2p, b2p, w3p, b3p)

    return out_padded[:batch, :num_outputs]


def init_params(key, num_inputs, num_outputs, num_hiddens1, num_hiddens2):
    """Deterministic init matching nn.Linear shapes (weights stored transposed)."""
    def linear(k, fan_in, fan_out):
        kw, kb = jax.random.split(k)
        bound = 1.0 / (fan_in ** 0.5)
        w = jax.random.uniform(kw, (fan_in, fan_out), jnp.float32, -bound, bound)
        b = jax.random.uniform(kb, (1, fan_out), jnp.float32, -bound, bound)
        return w, b

    k1, k2, k3 = jax.random.split(key, 3)
    w1, b1 = linear(k1, num_inputs, num_hiddens1)
    w2, b2 = linear(k2, num_hiddens1, num_hiddens2)
    w3, b3 = linear(k3, num_hiddens2, num_outputs)
    return (w1, b1, w2, b2, w3, b3)


if __name__ == "__main__":
    # Small shapes consistent with X = torch.arange(16).reshape((2, 8))
    batch = 2
    num_inputs = 8
    num_hiddens1 = 32
    num_hiddens2 = 32
    num_outputs = 4

    key = jax.random.PRNGKey(0)
    params = init_params(key, num_inputs, num_outputs, num_hiddens1, num_hiddens2)

    X = jnp.arange(16, dtype=jnp.float32).reshape((2, 8))
    seed = jnp.array([0], dtype=jnp.int32)

    out_train = net_forward(X, params, seed, num_inputs=num_inputs, training=True)
    out_eval = net_forward(X, params, seed, num_inputs=num_inputs, training=False)
    out_train, out_eval = jax.block_until_ready((out_train, out_eval))

    assert out_train.shape == (batch, num_outputs)
    assert out_eval.shape == (batch, num_outputs)
    assert out_train.dtype == jnp.float32
    assert bool(jnp.all(jnp.isfinite(out_train)))
    assert bool(jnp.all(jnp.isfinite(out_eval)))
    print("KERNEL_OK")
</pallas_src>

<mosaic_0001>
module attributes {stable_mosaic.version = 11 : i64} {
  func.func @mlp_kernel(%arg0: i32, %arg1: memref<1xi32, #tpu.memory_space<smem>>, %arg2: memref<8x128xf32, #tpu.memory_space<vmem>>, %arg3: memref<128x128xbf16, #tpu.memory_space<vmem>>, %arg4: memref<1x128xf32, #tpu.memory_space<vmem>>, %arg5: memref<128x128xbf16, #tpu.memory_space<vmem>>, %arg6: memref<1x128xf32, #tpu.memory_space<vmem>>, %arg7: memref<128x128xbf16, #tpu.memory_space<vmem>>, %arg8: memref<1x128xf32, #tpu.memory_space<vmem>>, %arg9: memref<8x128xf32, #tpu.memory_space<vmem>>) attributes {dimension_semantics = [#tpu.dimension_semantics<parallel>], iteration_bounds = array<i64: 1>, scalar_prefetch = 0 : i64, scratch_operands = 0 : i64, tpu.core_type = #tpu.core_type<tc>, window_params = [{transform_indices = @transform_0, window_bounds = array<i64: 1>}, {transform_indices = @transform_1, window_bounds = array<i64: 8, 128>}, {pipeline_mode = #tpu.pipeline_mode<synchronous>, transform_indices = @transform_2, window_bounds = array<i64: 128, 128>}, {pipeline_mode = #tpu.pipeline_mode<synchronous>, transform_indices = @transform_3, window_bounds = array<i64: 1, 128>}, {pipeline_mode = #tpu.pipeline_mode<synchronous>, transform_indices = @transform_4, window_bounds = array<i64: 128, 128>}, {pipeline_mode = #tpu.pipeline_mode<synchronous>, transform_indices = @transform_5, window_bounds = array<i64: 1, 128>}, {pipeline_mode = #tpu.pipeline_mode<synchronous>, transform_indices = @transform_6, window_bounds = array<i64: 128, 128>}, {pipeline_mode = #tpu.pipeline_mode<synchronous>, transform_indices = @transform_7, window_bounds = array<i64: 1, 128>}, {transform_indices = @transform_8, window_bounds = array<i64: 8, 128>}]} {
    %c0 = arith.constant 0 : index
    %0 = memref.load %arg1[%c0] : memref<1xi32, #tpu.memory_space<smem>>
    %c0_0 = arith.constant 0 : index
    %c0_1 = arith.constant 0 : index
    %1 = vector.load %arg2[%c0_0, %c0_1] : memref<8x128xf32, #tpu.memory_space<vmem>>, vector<8x128xf32>
    %2 = arith.truncf %1 : vector<8x128xf32> to vector<8x128xbf16>
    %c0_2 = arith.constant 0 : index
    %c0_3 = arith.constant 0 : index
    %3 = vector.load %arg3[%c0_2, %c0_3] : memref<128x128xbf16, #tpu.memory_space<vmem>>, vector<128x128xbf16>
    %cst = arith.constant dense<0.000000e+00> : vector<8x128xf32>
    %4 = tpu.matmul %2, %3, %cst {dimension_numbers = #tpu.dot_dimension_numbers<[1], [0], [0], [1], [0, 0, 1, 1], [], []>} : vector<8x128xbf16>, vector<128x128xbf16>, vector<8x128xf32> -> vector<8x128xf32>
    %c0_4 = arith.constant 0 : index
    %c0_5 = arith.constant 0 : index
    %5 = vector.load %arg4[%c0_4, %c0_5] : memref<1x128xf32, #tpu.memory_space<vmem>>, vector<1x128xf32>
    %6 = vector.broadcast %5 : vector<1x128xf32> to vector<8x128xf32>
    %7 = arith.addf %4, %6 : vector<8x128xf32>
    %cst_6 = arith.constant 0.000000e+00 : f32
    %8 = vector.broadcast %cst_6 : f32 to vector<8x128xf32>
    %9 = arith.maximumf %7, %8 : vector<8x128xf32>
    %c8_i32 = arith.constant 8 : i32
    %10 = arith.muli %arg0, %c8_i32 : i32
    %11 = tpu.iota {dimensions = array<i32: 0>} : vector<8x128xi32>
    %12 = vector.broadcast %10 : i32 to vector<8x128xi32>
    %13 = arith.addi %11, %12 : vector<8x128xi32>
    %14 = tpu.iota {dimensions = array<i32: 1>} : vector<8x128xi32>
    %c128_i32 = arith.constant 128 : i32
    %15 = vector.broadcast %c128_i32 : i32 to vector<8x128xi32>
    %16 = arith.muli %13, %15 : vector<8x128xi32>
    %17 = arith.addi %16, %14 : vector<8x128xi32>
    %c-1640531527_i32 = arith.constant -1640531527 : i32
    %18 = arith.muli %0, %c-1640531527_i32 : i32
    %19 = vector.broadcast %18 : i32 to vector<8x128xi32>
    %20 = arith.xori %17, %19 : vector<8x128xi32>
    %c-2048144789_i32 = arith.constant -2048144789 : i32
    %21 = vector.broadcast %c-2048144789_i32 : i32 to vector<8x128xi32>
    %22 = arith.xori %20, %21 : vector<8x128xi32>
    %c16_i32 = arith.constant 16 : i32
    %23 = vector.broadcast %c16_i32 : i32 to vector<8x128xi32>
    %24 = arith.shrui %22, %23 : vector<8x128xi32>
    %25 = arith.xori %22, %24 : vector<8x128xi32>
    %c2146121005_i32 = arith.constant 2146121005 : i32
    %26 = vector.broadcast %c2146121005_i32 : i32 to vector<8x128xi32>
    %27 = arith.muli %25, %26 : vector<8x128xi32>
    %c15_i32 = arith.constant 15 : i32
    %28 = vector.broadcast %c15_i32 : i32 to vector<8x128xi32>
    %29 = arith.shrui %27, %28 : vector<8x128xi32>
    %30 = arith.xori %27, %29 : vector<8x128xi32>
    %c-2073254261_i32 = arith.constant -2073254261 : i32
    %31 = vector.broadcast %c-2073254261_i32 : i32 to vector<8x128xi32>
    %32 = arith.muli %30, %31 : vector<8x128xi32>
    %c16_i32_7 = arith.constant 16 : i32
    %33 = vector.broadcast %c16_i32_7 : i32 to vector<8x128xi32>
    %34 = arith.shrui %32, %33 : vector<8x128xi32>
    %35 = arith.xori %32, %34 : vector<8x128xi32>
    %c2147483647_i32 = arith.constant 2147483647 : i32
    %36 = vector.broadcast %c2147483647_i32 : i32 to vector<8x128xi32>
    %37 = arith.andi %35, %36 : vector<8x128xi32>
    %c429496729_i32 = arith.constant 429496729 : i32
    %38 = vector.broadcast %c429496729_i32 : i32 to vector<8x128xi32>
    %39 = arith.cmpi sge, %37, %38 : vector<8x128xi32>
    %cst_8 = arith.constant 1.250000e+00 : f32
    %40 = vector.broadcast %cst_8 : f32 to vector<8x128xf32>
    %41 = arith.mulf %9, %40 : vector<8x128xf32>
    %cst_9 = arith.constant 0.000000e+00 : f32
    %42 = vector.broadcast %cst_9 : f32 to vector<8x128xf32>
    %43 = arith.select %39, %41, %42 : vector<8x128xi1>, vector<8x128xf32>
    %44 = arith.truncf %43 : vector<8x128xf32> to vector<8x128xbf16>
    %c0_10 = arith.constant 0 : index
    %c0_11 = arith.constant 0 : index
    %45 = vector.load %arg5[%c0_10, %c0_11] : memref<128x128xbf16, #tpu.memory_space<vmem>>, vector<128x128xbf16>
    %cst_12 = arith.constant dense<0.000000e+00> : vector<8x128xf32>
    %46 = tpu.matmul %44, %45, %cst_12 {dimension_numbers = #tpu.dot_dimension_numbers<[1], [0], [0], [1], [0, 0, 1, 1], [], []>} : vector<8x128xbf16>, vector<128x128xbf16>, vector<8x128xf32> -> vector<8x128xf32>
    %c0_13 = arith.constant 0 : index
    %c0_14 = arith.constant 0 : index
    %47 = vector.load %arg6[%c0_13, %c0_14] : memref<1x128xf32, #tpu.memory_space<vmem>>, vector<1x128xf32>
    %48 = vector.broadcast %47 : vector<1x128xf32> to vector<8x128xf32>
    %49 = arith.addf %46, %48 : vector<8x128xf32>
    %cst_15 = arith.constant 0.000000e+00 : f32
    %50 = vector.broadcast %cst_15 : f32 to vector<8x128xf32>
    %51 = arith.maximumf %49, %50 : vector<8x128xf32>
    %c8_i32_16 = arith.constant 8 : i32
    %52 = arith.muli %arg0, %c8_i32_16 : i32
    %53 = tpu.iota {dimensions = array<i32: 0>} : vector<8x128xi32>
    %54 = vector.broadcast %52 : i32 to vector<8x128xi32>
    %55 = arith.addi %53, %54 : vector<8x128xi32>
    %56 = tpu.iota {dimensions = array<i32: 1>} : vector<8x128xi32>
    %c128_i32_17 = arith.constant 128 : i32
    %57 = vector.broadcast %c128_i32_17 : i32 to vector<8x128xi32>
    %58 = arith.muli %55, %57 : vector<8x128xi32>
    %59 = arith.addi %58, %56 : vector<8x128xi32>
    %c-1640531527_i32_18 = arith.constant -1640531527 : i32
    %60 = arith.muli %0, %c-1640531527_i32_18 : i32
    %61 = vector.broadcast %60 : i32 to vector<8x128xi32>
    %62 = arith.xori %59, %61 : vector<8x128xi32>
    %c198677718_i32 = arith.constant 198677718 : i32
    %63 = vector.broadcast %c198677718_i32 : i32 to vector<8x128xi32>
    %64 = arith.xori %62, %63 : vector<8x128xi32>
    %c16_i32_19 = arith.constant 16 : i32
    %65 = vector.broadcast %c16_i32_19 : i32 to vector<8x128xi32>
    %66 = arith.shrui %64, %65 : vector<8x128xi32>
    %67 = arith.xori %64, %66 : vector<8x128xi32>
    %c2146121005_i32_20 = arith.constant 2146121005 : i32
    %68 = vector.broadcast %c2146121005_i32_20 : i32 to vector<8x128xi32>
    %69 = arith.muli %67, %68 : vector<8x128xi32>
    %c15_i32_21 = arith.constant 15 : i32
    %70 = vector.broadcast %c15_i32_21 : i32 to vector<8x128xi32>
    %71 = arith.shrui %69, %70 : vector<8x128xi32>
    %72 = arith.xori %69, %71 : vector<8x128xi32>
    %c-2073254261_i32_22 = arith.constant -2073254261 : i32
    %73 = vector.broadcast %c-2073254261_i32_22 : i32 to vector<8x128xi32>
    %74 = arith.muli %72, %73 : vector<8x128xi32>
    %c16_i32_23 = arith.constant 16 : i32
    %75 = vector.broadcast %c16_i32_23 : i32 to vector<8x128xi32>
    %76 = arith.shrui %74, %75 : vector<8x128xi32>
    %77 = arith.xori %74, %76 : vector<8x128xi32>
    %c2147483647_i32_24 = arith.constant 2147483647 : i32
    %78 = vector.broadcast %c2147483647_i32_24 : i32 to vector<8x128xi32>
    %79 = arith.andi %77, %78 : vector<8x128xi32>
    %c1073741824_i32 = arith.constant 1073741824 : i32
    %80 = vector.broadcast %c1073741824_i32 : i32 to vector<8x128xi32>
    %81 = arith.cmpi sge, %79, %80 : vector<8x128xi32>
    %cst_25 = arith.constant 2.000000e+00 : f32
    %82 = vector.broadcast %cst_25 : f32 to vector<8x128xf32>
    %83 = arith.mulf %51, %82 : vector<8x128xf32>
    %cst_26 = arith.constant 0.000000e+00 : f32
    %84 = vector.broadcast %cst_26 : f32 to vector<8x128xf32>
    %85 = arith.select %81, %83, %84 : vector<8x128xi1>, vector<8x128xf32>
    %86 = arith.truncf %85 : vector<8x128xf32> to vector<8x128xbf16>
    %c0_27 = arith.constant 0 : index
    %c0_28 = arith.constant 0 : index
    %87 = vector.load %arg7[%c0_27, %c0_28] : memref<128x128xbf16, #tpu.memory_space<vmem>>, vector<128x128xbf16>
    %cst_29 = arith.constant dense<0.000000e+00> : vector<8x128xf32>
    %88 = tpu.matmul %86, %87, %cst_29 {dimension_numbers = #tpu.dot_dimension_numbers<[1], [0], [0], [1], [0, 0, 1, 1], [], []>} : vector<8x128xbf16>, vector<128x128xbf16>, vector<8x128xf32> -> vector<8x128xf32>
    %c0_30 = arith.constant 0 : index
    %c0_31 = arith.constant 0 : index
    %89 = vector.load %arg8[%c0_30, %c0_31] : memref<1x128xf32, #tpu.memory_space<vmem>>, vector<1x128xf32>
    %90 = vector.broadcast %89 : vector<1x128xf32> to vector<8x128xf32>
    %91 = arith.addf %88, %90 : vector<8x128xf32>
    %c0_32 = arith.constant 0 : index
    %c0_33 = arith.constant 0 : index
    %92 = vector.load %arg9[%c0_32, %c0_33] : memref<8x128xf32, #tpu.memory_space<vmem>>, vector<8x128xf32>
    tpu.vector_store %arg9[%c0_32, %c0_33], %91 {strides = array<i32>} : memref<8x128xf32, #tpu.memory_space<vmem>>, vector<8x128xf32>,
    return
  }
  func.func @transform_0(%arg0: i32) -> i32 {
    %c0_i32 = arith.constant 0 : i32
    %c0_i32_0 = arith.constant 0 : i32
    return %c0_i32 : i32
  }
  func.func @transform_1(%arg0: i32) -> (i32, i32) {
    %c0_i32 = arith.constant 0 : i32
    %c0_i32_0 = arith.constant 0 : i32
    return %arg0, %c0_i32 : i32, i32
  }
  func.func @transform_2(%arg0: i32) -> (i32, i32) {
    %c0_i32 = arith.constant 0 : i32
    %c0_i32_0 = arith.constant 0 : i32
    %c0_i32_1 = arith.constant 0 : i32
    return %c0_i32, %c0_i32_0 : i32, i32
  }
  func.func @transform_3(%arg0: i32) -> (i32, i32) {
    %c0_i32 = arith.constant 0 : i32
    %c0_i32_0 = arith.constant 0 : i32
    %c0_i32_1 = arith.constant 0 : i32
    return %c0_i32, %c0_i32_0 : i32, i32
  }
  func.func @transform_4(%arg0: i32) -> (i32, i32) {
    %c0_i32 = arith.constant 0 : i32
    %c0_i32_0 = arith.constant 0 : i32
    %c0_i32_1 = arith.constant 0 : i32
    return %c0_i32, %c0_i32_0 : i32, i32
  }
  func.func @transform_5(%arg0: i32) -> (i32, i32) {
    %c0_i32 = arith.constant 0 : i32
    %c0_i32_0 = arith.constant 0 : i32
    %c0_i32_1 = arith.constant 0 : i32
    return %c0_i32, %c0_i32_0 : i32, i32
  }
  func.func @transform_6(%arg0: i32) -> (i32, i32) {
    %c0_i32 = arith.constant 0 : i32
    %c0_i32_0 = arith.constant 0 : i32
    %c0_i32_1 = arith.constant 0 : i32
    return %c0_i32, %c0_i32_0 : i32, i32
  }
  func.func @transform_7(%arg0: i32) -> (i32, i32) {
    %c0_i32 = arith.constant 0 : i32
    %c0_i32_0 = arith.constant 0 : i32
    %c0_i32_1 = arith.constant 0 : i32
    return %c0_i32, %c0_i32_0 : i32, i32
  }
  func.func @transform_8(%arg0: i32) -> (i32, i32) {
    %c0_i32 = arith.constant 0 : i32
    %c0_i32_0 = arith.constant 0 : i32
    return %arg0, %c0_i32 : i32, i32
  }
}

</mosaic_0001>

<bundles_post_ra>
// kernel: tpu_custom_call.1
= control target key start
LH: loop header
LB: loop body
LE: loop exit
PB: predicated region body
PF: predicated region fallthrough
CT: control target
= control target key end

     0   :  { %14 = vsyncpa [#allocation4], 0  ;;  %s917_s0 = inlined_call_operand.<no memory space> [shape: s32[1], index: 0, kind: input, shape index: {}]   ;;  %s918_s1 = inlined_call_operand.hbm [shape: f32[8,128], index: 1, kind: input, shape index: {}]   ;;  %s919_s2 = inlined_call_operand.hbm [shape: bf16[128,128], index: 2, kind: input, shape index: {}]   ;;  %s920_s3 = inlined_call_operand.vmem [shape: f32[1,128], index: 3, kind: input, shape index: {}]   ;;  %s921_s4 = inlined_call_operand.hbm [shape: bf16[128,128], index: 4, kind: input, shape index: {}]   ;;  %s922_s5 = inlined_call_operand.vmem [shape: f32[1,128], index: 5, kind: input, shape index: {}]   ;;  %s923_s6 = inlined_call_operand.hbm [shape: bf16[128,128], index: 6, kind: input, shape index: {}]   ;;  %s924_s7 = inlined_call_operand.vmem [shape: f32[1,128], index: 7, kind: input, shape index: {}]   ;;  %s925_s8 = inlined_call_operand.hbm [shape: f32[8,128], index: 8, kind: output, shape index: {}]  }
   0x1   :  { %15 = vsyncpa [#allocation7], 0 }
   0x2   :  { %16 = vsyncpa [#allocation10], 0 }
   0x3   :  { %17 = vsyncpa [#allocation5], 0  ;;  %s752_s27 = smov [#allocation6]   ;;  %s634_s9 = scalar_lea.hbm %s919_s2, 1024 }
   0x4   :  { %s35_s28 = sshll.u32 %s752_s27, 4  ;;  %p635_p0 = scmp.ne.s32.totalorder %s919_s2, %s634_s9  ;;  %s36_s28 = int_to_ptr.vmem [resolvable:$true] %s35_s28 }
   0x5   :  { %p638_p1 = scmp.lt.u32.totalorder %s634_s9, %s919_s2 }
   0x7   :  { %p640_p2 = pnand %p638_p1, %p635_p0 }
   0x9   :  { %643 = shalt.err (!%p640_p2)
}
   0xa   :  { %s644_s14 = scalar_lea.vmem %s36_s28, 1024  ;;  %p649_p4 = scmp.lt.s32.totalorder %s36_s28, %s36_s28 }
   0xb   :  { %p645_p3 = scmp.ne.s32.totalorder %s36_s28, %s644_s14  ;;  %p650_p5 = scmp.lt.s32.totalorder %s644_s14, %s644_s14 }
   0xd   :  { %p651_p6 = por %p650_p5, %p649_p4 }
   0xf   :  { %p652_p7 = pnand %p651_p6, %p645_p3 }
  0x11   :  { %655 = shalt.err (!%p652_p7)
}
  0x12   :  { %s753_s15 = smov 64   ;;  %s754_s16 = smov 4  }
  0x13   :  { %41 = dma.hbm_to_vmem [thread:$0]  %s919_s2, 1024, %s36_s28, [#allocation7], %s753_s15, %s753_s15, %s754_s16  }
  0x14   :  { %s755_s19 = smov [#allocation3]   ;;  %s756_s21 = smov [#allocation8]  }
  0x15   :  { %s26_s20 = sshll.u32 %s755_s19, 4  ;;  %s49_s22 = sshll.u32 %s756_s21, 4  ;;  %s27_s20 = int_to_ptr.vmem [resolvable:$true] %s26_s20  ;;  %s50_s22 = int_to_ptr.vmem [resolvable:$true] %s49_s22 }
  0x16   :  { %s656_s25 = scalar_lea.hbm %s918_s1, 128 }
  0x17   :  { %p657_p8 = scmp.ne.s32.totalorder %s918_s1, %s656_s25  ;;  %p660_p9 = scmp.lt.u32.totalorder %s656_s25, %s918_s1 }
  0x19   :  { %p662_p10 = pnand %p660_p9, %p657_p8 }
  0x1b   :  { %665 = shalt.err (!%p662_p10)
}
  0x1c   :  { %s666_s2 = scalar_lea.vmem %s27_s20, 128  ;;  %p671_p12 = scmp.lt.s32.totalorder %s27_s20, %s27_s20 }
  0x1d   :  { %p667_p11 = scmp.ne.s32.totalorder %s27_s20, %s666_s2  ;;  %p672_p13 = scmp.lt.s32.totalorder %s666_s2, %s666_s2 }
  0x1f   :  { %p673_p0 = por %p672_p13, %p671_p12 }
  0x21   :  { %p674_p1 = pnand %p673_p0, %p667_p11 }
  0x23   :  { %677 = shalt.err (!%p674_p1)
}
  0x24   :  { %29 = dma.hbm_to_vmem [thread:$0]  %s918_s1, 128, %s27_s20, [#allocation4]  }
  0x25   :  { %s678_s12 = scalar_lea.hbm %s921_s4, 1024 }
  0x26   :  { %p679_p2 = scmp.ne.s32.totalorder %s921_s4, %s678_s12  ;;  %p682_p3 = scmp.lt.u32.totalorder %s678_s12, %s921_s4 }
  0x28   :  { %p684_p4 = pnand %p682_p3, %p679_p2 }
  0x2a   :  { %687 = shalt.err (!%p684_p4)
}
  0x2b   :  { %s688_s19 = scalar_lea.vmem %s50_s22, 1024  ;;  %p693_p6 = scmp.lt.s32.totalorder %s50_s22, %s50_s22 }
  0x2c   :  { %p689_p5 = scmp.ne.s32.totalorder %s50_s22, %s688_s19  ;;  %p694_p7 = scmp.lt.s32.totalorder %s688_s19, %s688_s19 }
  0x2e   :  { %p695_p8 = por %p694_p7, %p693_p6 }
  0x30   :  { %p696_p9 = pnand %p695_p8, %p689_p5 }
  0x32   :  { %699 = shalt.err (!%p696_p9)
}
  0x33   :  { %55 = dma.hbm_to_vmem [thread:$0]  %s921_s4, 1024, %s50_s22, [#allocation7], %s753_s15, %s753_s15, %s754_s16  }
  0x34   :  { %s757_s21 = smov [#allocation9]   ;;  %s700_s26 = scalar_lea.hbm %s923_s6, 1024 }
  0x35   :  { %s63_s23 = sshll.u32 %s757_s21, 4  ;;  %p701_p10 = scmp.ne.s32.totalorder %s923_s6, %s700_s26  ;;  %s64_s23 = int_to_ptr.vmem [resolvable:$true] %s63_s23 }
  0x36   :  { %p704_p11 = scmp.lt.u32.totalorder %s700_s26, %s923_s6 }
  0x38   :  { %p706_p12 = pnand %p704_p11, %p701_p10 }
  0x3a   :  { %709 = shalt.err (!%p706_p12)
}
  0x3b   :  { %s710_s28 = scalar_lea.vmem %s64_s23, 1024  ;;  %p715_p0 = scmp.lt.s32.totalorder %s64_s23, %s64_s23 }
  0x3c   :  { %p711_p13 = scmp.ne.s32.totalorder %s64_s23, %s710_s28  ;;  %p716_p1 = scmp.lt.s32.totalorder %s710_s28, %s710_s28 }
  0x3e   :  { %p717_p2 = por %p716_p1, %p715_p0 }
  0x40   :  { %p718_p3 = pnand %p717_p2, %p711_p13 }
  0x42   :  { %721 = shalt.err (!%p718_p3)
}
  0x43   :  { %69 = dma.hbm_to_vmem [thread:$0]  %s923_s6, 1024, %s64_s23, [#allocation10], %s753_s15, %s753_s15, %s754_s16  }
  0x44   :  { %744 = dma.done.wait [#allocation4], 128  }
  0x45   :  { %745 = vsyncadd [#allocation4], 4294967168 }
  0x46   :  { %746 = dma.done.wait [#allocation7], 2048  }
  0x47   :  { %747 = vsyncadd [#allocation7], 4294965248 }
  0x48   :  { %748 = dma.done.wait [#allocation10], 1024  }
  0x49   :  { %749 = vsyncadd [#allocation10], 4294966272  ;;  %v758_v0 = vmov 0.0   ;;  %vm759_vm0 = vmmov 0   ;;  %v610_v1 = vld [vmem:[#allocation6] sm:$0xff]   ;;  %v611_v2 = vld [vmem:[#allocation6 + $0x8] sm:$0xff]   ;;  %v201_v25 = vlaneseq }
  0x4a   :  { %541 = vmatprep.subr.bf16.mxu0 %v758_v0  ;;  %557 = vmatprep.mubr.msk.bf16.mxu0 %vm759_vm0, %v758_v0  ;;  %v612_v3 = vld [vmem:[#allocation6 + $0x10] sm:$0xff]   ;;  %v618_v4 = vld [vmem:[#allocation8] sm:$0xff]   ;;  %v613_v5 = vld [vmem:[#allocation6 + $0x18] sm:$0xff]   ;;  %s209_s16 = smul.u32 2654435769, %s917_s0  ;;  %s760_s13 = smov [#allocation11]  }
  0x4b   :  { %561 = vmatprep.subr.bf16.mxu1 %v758_v0  ;;  %577 = vmatprep.mubr.msk.bf16.mxu1 %vm759_vm0, %v758_v0  ;;  %v619_v6 = vld [vmem:[#allocation8 + $0x8] sm:$0xff]   ;;  %v614_v7 = vld [vmem:[#allocation6 + $0x20] sm:$0xff]   ;;  %v620_v8 = vld [vmem:[#allocation8 + $0x10] sm:$0xff]   ;;  %v202_v26 = vshrl.u32 %v201_v25, 7  ;;  %v206_v27 = vand.u32 127, %v201_v25  ;;  %s470_s14 = sshll.u32 %s760_s13, 4  ;;  %s471_s14 = int_to_ptr.vmem [resolvable:$true] %s470_s14 }
  0x4c   :  { %542 = vmatpush3.bf16.msra.mxu0 %v610_v1  ;;  %562 = vmatpush3.bf16.msra.mxu1 %v618_v4  ;;  %v615_v9 = vld [vmem:[#allocation6 + $0x28] sm:$0xff]   ;;  %v621_v10 = vld [vmem:[#allocation8 + $0x18] sm:$0xff]   ;;  %v616_v11 = vld [vmem:[#allocation6 + $0x30] sm:$0xff]   ;;  %v210_v30 = vstv %s209_s16  ;;  %p727_p5 = scmp.lt.s32.totalorder %s471_s14, %s471_s14 }
  0x4d   :  { %543 = vmatprep.subr.bf16.mxu0 %v758_v0  ;;  %563 = vmatprep.subr.bf16.mxu1 %v758_v0  ;;  %v622_v12 = vld [vmem:[#allocation8 + $0x20] sm:$0xff]   ;;  %v617_v13 = vld [vmem:[#allocation6 + $0x38] sm:$0xff]   ;;  %v623_v15 = vld [vmem:[#allocation8 + $0x28] sm:$0xff]   ;;  %v207_v28 = vmul.u32 128, %v202_v26 }
  0x4e   :  { %v86_v14 = vld [vmem:[#allocation3] sm:$0xff]  ;;  %v624_v17 = vld [vmem:[#allocation8 + $0x30] sm:$0xff]   ;;  %v626_v19 = vld [vmem:[#allocation9] sm:$0xff]  }
  0x4f   :  { %v87_v16 = vpack.c.bf16 %v86_v14, %v86_v14  ;;  %v625_v18 = vld [vmem:[#allocation8 + $0x38] sm:$0xff]   ;;  %v627_v20 = vld [vmem:[#allocation9 + $0x8] sm:$0xff]   ;;  %v628_v21 = vld [vmem:[#allocation9 + $0x10] sm:$0xff]   ;;  %v208_v29 = vadd.s32 %v207_v28, %v206_v27 }
  0x50   :  { %544 = vmatpush3.bf16.msra.mxu0 %v611_v2  ;;  %564 = vmatpush3.bf16.msra.mxu1 %v619_v6  ;;  %v629_v22 = vld [vmem:[#allocation9 + $0x18] sm:$0xff]   ;;  %v630_v23 = vld [vmem:[#allocation9 + $0x20] sm:$0xff]   ;;  %v631_v24 = vld [vmem:[#allocation9 + $0x28] sm:$0xff]  }
  0x51   :  { %545 = vmatprep.subr.bf16.mxu0 %v758_v0  ;;  %565 = vmatprep.subr.bf16.mxu1 %v758_v0  ;;  %v211_v31 = vxor.u32 %v210_v30, %v208_v29  ;;  %v481_v41 = vld [vmem:[%s920_s3] ss:$0 sm:$0xff]  ;;  %v632_v51 = vld [vmem:[#allocation9 + $0x30] sm:$0xff]  }
  0x52   :  { %v633_v52 = vld [vmem:[#allocation9 + $0x38] sm:$0xff]  }
  0x53   :  { %v212_v32 = vxor.u32 2246822507, %v211_v31  ;;  %v338_v53 = vxor.u32 198677718, %v211_v31  ;;  %v490_v62 = vld [vmem:[%s922_s5] ss:$0 sm:$0xff] }
  0x54   :  { %546 = vmatpush3.bf16.msra.mxu0 %v612_v3  ;;  %566 = vmatpush3.bf16.msra.mxu1 %v620_v8  ;;  %v502_v8 = vld [vmem:[%s924_s7] ss:$0 sm:$0xff]  ;;  %s722_s5 = scalar_lea.vmem %s471_s14, 128 }
  0x55   :  { %547 = vmatprep.subr.bf16.mxu0 %v758_v0  ;;  %567 = vmatprep.subr.bf16.mxu1 %v758_v0  ;;  %v213_v33 = vshrl.u32 %v212_v32, 16  ;;  %v339_v54 = vshrl.u32 %v338_v53, 16  ;;  %p723_p4 = scmp.ne.s32.totalorder %s471_s14, %s722_s5  ;;  %p728_p6 = scmp.lt.s32.totalorder %s722_s5, %s722_s5 }
  0x57   :  { %v214_v34 = vxor.u32 %v213_v33, %v212_v32  ;;  %v340_v55 = vxor.u32 %v339_v54, %v338_v53  ;;  %p729_p7 = por %p728_p6, %p727_p5 }
  0x58   :  { %548 = vmatpush3.bf16.msra.mxu0 %v613_v5  ;;  %568 = vmatpush3.bf16.msra.mxu1 %v621_v10 }
  0x59   :  { %549 = vmatprep.subr.bf16.mxu0 %v758_v0  ;;  %569 = vmatprep.subr.bf16.mxu1 %v758_v0  ;;  %v215_v35 = vmul.u32 2146121005, %v214_v34  ;;  %v341_v56 = vmul.u32 2146121005, %v340_v55  ;;  %p730_p8 = pnand %p729_p7, %p723_p4 }
  0x5b   :  { %v216_v36 = vshrl.u32 %v215_v35, 15  ;;  %v342_v57 = vshrl.u32 %v341_v56, 15 }
  0x5c   :  { %550 = vmatpush3.bf16.msra.mxu0 %v614_v7  ;;  %570 = vmatpush3.bf16.msra.mxu1 %v622_v12 }
  0x5d   :  { %551 = vmatprep.subr.bf16.mxu0 %v758_v0  ;;  %571 = vmatprep.subr.bf16.mxu1 %v758_v0  ;;  %v217_v37 = vxor.u32 %v216_v36, %v215_v35  ;;  %v343_v58 = vxor.u32 %v342_v57, %v341_v56 }
  0x5f   :  { %v218_v38 = vmul.u32 2221713035, %v217_v37  ;;  %v344_v59 = vmul.u32 2221713035, %v343_v58 }
  0x60   :  { %552 = vmatpush3.bf16.msra.mxu0 %v615_v9  ;;  %572 = vmatpush3.bf16.msra.mxu1 %v623_v15 }
  0x61   :  { %553 = vmatprep.subr.bf16.mxu0 %v758_v0  ;;  %573 = vmatprep.subr.bf16.mxu1 %v758_v0  ;;  %v219_v39 = vshrl.u32 %v218_v38, 16  ;;  %v345_v60 = vshrl.u32 %v344_v59, 16 }
  0x63   :  { %v220_v40 = vxor.u32 %v219_v39, %v218_v38  ;;  %v346_v61 = vxor.u32 %v345_v60, %v344_v59 }
  0x64   :  { %554 = vmatpush3.bf16.msra.mxu0 %v616_v11  ;;  %574 = vmatpush3.bf16.msra.mxu1 %v624_v17 }
  0x65   :  { %555 = vmatprep.subr.bf16.mxu0 %v758_v0  ;;  %575 = vmatprep.subr.bf16.mxu1 %v758_v0  ;;  %v221_v42 = vand.u32 2147483647, %v220_v40  ;;  %v347_v63 = vand.u32 2147483647, %v346_v61 }
  0x67   :  { %vm222_vm1 = vcmp.ge.s32.totalorder %v221_v42, 429496729  ;;  %vm348_vm3 = vcmp.ge.s32.totalorder %v347_v63, 1073741824 }
  0x68   :  { %556 = vmatpush3.bf16.msra.mxu0 %v617_v13  ;;  %576 = vmatpush3.bf16.msra.mxu1 %v625_v18  ;;  %vm499_vm2 = vmpackc.low %vm222_vm1, %vm222_vm1 }
  0x69   :  { %581 = vmatprep.subr.bf16.mxu0 %v758_v0  ;;  %vm511_vm4 = vmpackc.low %vm348_vm3, %vm348_vm3 }
  0x6b   :  { %558 = vmatmul.mubr.bf16.vlgmr.msra.gmra.mrb[0].mxu0 %v87_v16 }
  0x6c   :  { %597 = vmatprep.mubr.msk.bf16.mxu0 %vm759_vm0, %v758_v0  ;;  %582 = vmatpush3.bf16.msra.mxu0 %v626_v19 }
  0x6d   :  { %583 = vmatprep.subr.bf16.mxu0 %v758_v0 }
  0x70   :  { %584 = vmatpush3.bf16.msra.mxu0 %v627_v20 }
  0x71   :  { %585 = vmatprep.subr.bf16.mxu0 %v758_v0 }
  0x74   :  { %586 = vmatpush3.bf16.msra.mxu0 %v628_v21 }
  0x75   :  { %587 = vmatprep.subr.bf16.mxu0 %v758_v0 }
  0x78   :  { %588 = vmatpush3.bf16.msra.mxu0 %v629_v22 }
  0x79   :  { %589 = vmatprep.subr.bf16.mxu0 %v758_v0 }
  0x7c   :  { %590 = vmatpush3.bf16.msra.mxu0 %v630_v23 }
  0x7d   :  { %591 = vmatprep.subr.bf16.mxu0 %v758_v0 }
  0x80   :  { %592 = vmatpush3.bf16.msra.mxu0 %v631_v24 }
  0x81   :  { %593 = vmatprep.subr.bf16.mxu0 %v758_v0 }
  0x84   :  { %594 = vmatpush3.bf16.msra.mxu0 %v632_v51 }
  0x85   :  { %595 = vmatprep.subr.bf16.mxu0 %v758_v0 }
  0x88   :  { %596 = vmatpush3.bf16.msra.mxu0 %v633_v52 }
 0x13e   :  { %v193_v43 = vpop.f32.mrb[0].mxu0 }
 0x13f   :  { %v194_v44 = vadd.f32 %v481_v41, %v193_v43  ;;  %v559_v45 = vpop.f32.mrb[1].mxu0 }
 0x140   :  { %v196_v46 = vpop.f32.mrb[2].mxu0 }
 0x141   :  { %v199_v47 = vmax.f32 %v194_v44, 0.0  ;;  %v560_v48 = vpop.f32.mrb[3].mxu0 }
 0x143   :  { %v223_v49 = vmul.f32 1.25, %v199_v47 }
 0x145   :  { %v500_v50 = vpack.c.bf16 %v223_v49, %v223_v49 }
 0x147   :  { %578 = vmatmul.mubr.msk.bf16.vlgmr.msra.gmra.mrb[0].mxu1 %vm499_vm2, %v500_v50 }
 0x21a   :  { %v331_v1 = vpop.f32.mrb[0].mxu1 }
 0x21b   :  { %v332_v2 = vadd.f32 %v490_v62, %v331_v1  ;;  %v579_v3 = vpop.f32.mrb[1].mxu1 }
 0x21c   :  { %v334_v0 = vpop.f32.mrb[2].mxu1 }
 0x21d   :  { %v337_v4 = vmax.f32 %v332_v2, 0.0  ;;  %v580_v5 = vpop.f32.mrb[3].mxu1 }
 0x21f   :  { %v349_v6 = vmul.f32 2.0, %v337_v4 }
 0x221   :  { %v512_v7 = vpack.c.bf16 %v349_v6, %v349_v6 }
 0x223   :  { %598 = vmatmul.mubr.msk.bf16.vlgmr.msra.gmra.mrb[4].mxu0 %vm511_vm4, %v512_v7 }
 0x2f6   :  { %v457_v9 = vpop.f32.mrb[4].mxu0 }
 0x2f7   :  { %v458_v10 = vadd.f32 %v502_v8, %v457_v9  ;;  %v599_v11 = vpop.f32.mrb[5].mxu0 }
 0x2f8   :  { %v460_v12 = vpop.f32.mrb[6].mxu0 }
 0x2f9   :  { %463 = vst [vmem:[#allocation11] sm:$0xff] %v458_v10  ;;  %v600_v13 = vpop.f32.mrb[7].mxu0 }
 0x2fa   :  { %733 = shalt.err (!%p730_p8)
}
 0x2fb   :  { %s734_s7 = scalar_lea.hbm %s925_s8, 128 }
 0x2fc   :  { %p735_p9 = scmp.ne.s32.totalorder %s925_s8, %s734_s7  ;;  %p738_p10 = scmp.lt.u32.totalorder %s734_s7, %s925_s8 }
 0x2fe   :  { %p740_p11 = pnand %p738_p10, %p735_p9 }
 0x300   :  { %743 = shalt.err (!%p740_p11)
}
 0x301   :  { %473 = dma.vmem_to_hbm [thread:$0]  %s471_s14, 128, %s925_s8, [#allocation5]  }
 0x302   :  { %750 = dma.done.wait [#allocation5], 128  }
 0x303   :  { %751 = vsyncadd [#allocation5], 4294967168 }
 0x304   :  { %477 = vsyncpa [#allocation4], 1 }
 0x305   :  { %478 = vsyncpa [#allocation7], 1 }
 0x306   :  { %479 = vsyncpa [#allocation10], 1 }
 0x307   :  { %480 = vsyncpa [#allocation5], 1 }

</bundles_post_ra>
